<compile_context>
chip_gen: v7x
topology: tpu7x:2x2x1
jax: 0.10.0
libtpu: 0.0.40
codegen_flags: <defaults>
</compile_context>

<pallas_src>
import functools

import jax
import jax.numpy as jnp
from jax.experimental import pallas as pl
from jax.experimental.pallas import tpu as pltpu

_LANES = 128


def _sublane_min(dtype) -> int:
    """Minimum second-minor tile for this dtype (f32: 8, bf16: 16, int8/fp8: 32)."""
    itemsize = jnp.dtype(dtype).itemsize
    return {4: 8, 2: 16, 1: 32}.get(itemsize, 8)


def _rso_math(pc, pr, rc, rr, gamma):
    """Shared RSO math (kernel body, jnp fast path, tail epilogue)."""
    chosen = gamma * (pc - rc)
    rejected = gamma * (pr - rr)
    # gamma * logits == chosen - rejected
    losses = jnp.maximum(1.0 - (chosen - rejected), 0.0)
    return losses, chosen, rejected


def _rso_kernel(
    pol_chosen_ref,
    pol_rejected_ref,
    ref_chosen_ref,
    ref_rejected_ref,
    losses_ref,
    chosen_rewards_ref,
    rejected_rewards_ref,
    *,
    gamma: float,
):
    # Upcast once per tile to f32 (v5e VPU has no bf16 path); cast back at store.
    pc = pol_chosen_ref[...].astype(jnp.float32)
    pr = pol_rejected_ref[...].astype(jnp.float32)
    rc = ref_chosen_ref[...].astype(jnp.float32)
    rr = ref_rejected_ref[...].astype(jnp.float32)

    losses, chosen, rejected = _rso_math(pc, pr, rc, rr, gamma)

    losses_ref[...] = losses.astype(losses_ref.dtype)
    chosen_rewards_ref[...] = chosen.astype(chosen_rewards_ref.dtype)
    rejected_rewards_ref[...] = rejected.astype(rejected_rewards_ref.dtype)


def rso_loss(
    policy_chosen_logps,
    policy_rejected_logps,
    reference_chosen_logps,
    reference_rejected_logps,
    *,
    gamma: float = 0.1,
    block_rows: int = 2048,
    force_pallas: bool = False,
):
    assert (
        policy_chosen_logps.shape
        == policy_rejected_logps.shape
        == reference_chosen_logps.shape
        == reference_rejected_logps.shape
    )
    orig_shape = policy_chosen_logps.shape
    dtype = policy_chosen_logps.dtype
    itemsize = jnp.dtype(dtype).itemsize

    flats = [
        x.reshape(-1)
        for x in (
            policy_chosen_logps,
            policy_rejected_logps,
            reference_chosen_logps,
            reference_rejected_logps,
        )
    ]
    b = int(flats[0].size)

    sublane = _sublane_min(dtype)
    tile_elems = sublane * _LANES

    # ---- Small-batch fast path: fused XLA elementwise beats kernel overhead.
    if not force_pallas and b < 16 * tile_elems:
        outs = _rso_math(*[f.astype(jnp.float32) for f in flats], gamma)
        return tuple(o.astype(dtype).reshape(orig_shape) for o in outs)

    # ---- Pallas path.
    main = (b // _LANES) * _LANES  # elements handled by the kernel
    pad = 0
    if main == 0:
        # Tiny forced case: pad up to a single full tile (cheap at this size).
        pad = tile_elems - b
        main = tile_elems
    rows = main // _LANES

    def _prep(x):
        if pad:
            x = jnp.pad(x, (0, pad))
        elif main < b:
            x = x[:main]
        return x.reshape(rows, _LANES)  # metadata-only when pad==0 and main==b

    main_in = [_prep(f) for f in flats]

    # Block rows: dtype-aligned, big enough to sit near the HBM roofline,
    # small enough for v7x's 64 MiB VMEM, and >=2 grid steps when possible so
    # both v7x TensorCores get work.
    blk = max(sublane, (min(block_rows, rows) // sublane) * sublane)
    if pl.cdiv(rows, blk) < 2 and rows >= 2 * sublane:
        blk = ((pl.cdiv(rows, 2) + sublane - 1) // sublane) * sublane
    blk = min(blk, 4096)

    grid = (pl.cdiv(rows, blk),)
    spec = pl.BlockSpec((blk, _LANES), lambda i: (i, 0))

    block_bytes = blk * _LANES * itemsize
    # 7 streams x 2 pipeline buffers + headroom; clamp to stay safe on v5e
    # (16 MiB scoped default) and within v7x's 64 MiB physical VMEM.
    vmem_limit = int(min(max(7 * 2 * block_bytes + (4 << 20), 16 << 20), 48 << 20))

    kernel = functools.partial(_rso_kernel, gamma=float(gamma))

    out_main = pl.pallas_call(
        kernel,
        out_shape=tuple(
            jax.ShapeDtypeStruct((rows, _LANES), dtype) for _ in range(3)
        ),
        grid_spec=pltpu.PrefetchScalarGridSpec(
            num_scalar_prefetch=0,
            grid=grid,
            in_specs=[spec, spec, spec, spec],
            out_specs=(spec, spec, spec),
        ),
        compiler_params=pltpu.CompilerParams(
            dimension_semantics=("parallel",),
            vmem_limit_bytes=vmem_limit,
        ),
        cost_estimate=pl.CostEstimate(
            flops=7 * rows * _LANES,
            transcendentals=0,
            bytes_accessed=7 * rows * _LANES * itemsize,
        ),
    )(*main_in)

    out_flat = [o.reshape(-1) for o in out_main]

    if pad:
        out_flat = [o[:b] for o in out_flat]
    elif main < b:
        # <128-element tail: tiny jnp epilogue instead of padding whole arrays.
        tail_in = [f[main:].astype(jnp.float32) for f in flats]
        tail_out = _rso_math(*tail_in, gamma)
        out_flat = [
            jnp.concatenate([o, t.astype(dtype)]) for o, t in zip(out_flat, tail_out)
        ]

    return tuple(o.reshape(orig_shape) for o in out_flat)


def _rso_loss_ref(pc, pr, rc, rr, gamma=0.1):
    logits = (pc - pr) - (rc - rr)
    losses = jax.nn.relu(1.0 - gamma * logits)
    return losses, gamma * (pc - rc), gamma * (pr - rr)


if __name__ == "__main__":
    gamma = 0.1
    key = jax.random.PRNGKey(0)

    # --- Small batch of preference pairs (consistent with the module) -------
    B = 8
    k1, k2, k3, k4 = jax.random.split(key, 4)
    policy_chosen = -jnp.abs(jax.random.normal(k1, (B,), jnp.float32)) * 10.0
    policy_rejected = -jnp.abs(jax.random.normal(k2, (B,), jnp.float32)) * 10.0
    ref_chosen = -jnp.abs(jax.random.normal(k3, (B,), jnp.float32)) * 10.0
    ref_rejected = -jnp.abs(jax.random.normal(k4, (B,), jnp.float32)) * 10.0

    # Force the Pallas path so the kernel itself is exercised at this size.
    losses, cr, rr = jax.block_until_ready(
        rso_loss(
            policy_chosen, policy_rejected, ref_chosen, ref_rejected,
            gamma=gamma, force_pallas=True,
        )
    )
    e_losses, e_cr, e_rr = _rso_loss_ref(
        policy_chosen, policy_rejected, ref_chosen, ref_rejected, gamma=gamma
    )
    assert losses.shape == (B,)
    assert jnp.allclose(losses, e_losses, atol=1e-6, rtol=1e-6)
    assert jnp.allclose(cr, e_cr, atol=1e-6, rtol=1e-6)
    assert jnp.allclose(rr, e_rr, atol=1e-6, rtol=1e-6)

    # Auto dispatch (jnp fast path at this size) must match as well.
    a_losses, a_cr, a_rr = jax.block_until_ready(
        rso_loss(policy_chosen, policy_rejected, ref_chosen, ref_rejected, gamma=gamma)
    )
    assert jnp.allclose(a_losses, e_losses, atol=1e-6, rtol=1e-6)
    assert jnp.allclose(a_cr, e_cr, atol=1e-6, rtol=1e-6)
    assert jnp.allclose(a_rr, e_rr, atol=1e-6, rtol=1e-6)

    # --- Slightly larger, non-multiple-of-128 batch: exercises the multi-step
    # grid (2 TensorCore shards on v7x) and the jnp tail epilogue. -----------
    B2 = 2080
    k5, k6, k7, k8 = jax.random.split(jax.random.PRNGKey(1), 4)
    pc2 = -jnp.abs(jax.random.normal(k5, (B2,), jnp.float32)) * 10.0
    pr2 = -jnp.abs(jax.random.normal(k6, (B2,), jnp.float32)) * 10.0
    rc2 = -jnp.abs(jax.random.normal(k7, (B2,), jnp.float32)) * 10.0
    rr2 = -jnp.abs(jax.random.normal(k8, (B2,), jnp.float32)) * 10.0

    l2, c2, r2 = jax.block_until_ready(
        rso_loss(pc2, pr2, rc2, rr2, gamma=gamma, force_pallas=True)
    )
    el2, ec2, er2 = _rso_loss_ref(pc2, pr2, rc2, rr2, gamma=gamma)
    assert l2.shape == (B2,)
    assert jnp.allclose(l2, el2, atol=1e-6, rtol=1e-6)
    assert jnp.allclose(c2, ec2, atol=1e-6, rtol=1e-6)
    assert jnp.allclose(r2, er2, atol=1e-6, rtol=1e-6)

    print("KERNEL_OK")
</pallas_src>

<mosaic_0001>
module attributes {stable_mosaic.version = 11 : i64} {
  func.func @_rso_kernel(%arg0: i32, %arg1: memref<8x128xf32, #tpu.memory_space<vmem>>, %arg2: memref<8x128xf32, #tpu.memory_space<vmem>>, %arg3: memref<8x128xf32, #tpu.memory_space<vmem>>, %arg4: memref<8x128xf32, #tpu.memory_space<vmem>>, %arg5: memref<8x128xf32, #tpu.memory_space<vmem>>, %arg6: memref<8x128xf32, #tpu.memory_space<vmem>>, %arg7: memref<8x128xf32, #tpu.memory_space<vmem>>) attributes {dimension_semantics = [#tpu.dimension_semantics<parallel>], iteration_bounds = array<i64: 1>, scalar_prefetch = 0 : i64, scratch_operands = 0 : i64, tpu.core_type = #tpu.core_type<tc>, window_params = [{transform_indices = @transform_0, window_bounds = array<i64: 8, 128>}, {transform_indices = @transform_1, window_bounds = array<i64: 8, 128>}, {transform_indices = @transform_2, window_bounds = array<i64: 8, 128>}, {transform_indices = @transform_3, window_bounds = array<i64: 8, 128>}, {transform_indices = @transform_4, window_bounds = array<i64: 8, 128>}, {transform_indices = @transform_5, window_bounds = array<i64: 8, 128>}, {transform_indices = @transform_6, window_bounds = array<i64: 8, 128>}]} {
    %c0 = arith.constant 0 : index
    %c0_0 = arith.constant 0 : index
    %0 = vector.load %arg1[%c0, %c0_0] : memref<8x128xf32, #tpu.memory_space<vmem>>, vector<8x128xf32>
    %c0_1 = arith.constant 0 : index
    %c0_2 = arith.constant 0 : index
    %1 = vector.load %arg2[%c0_1, %c0_2] : memref<8x128xf32, #tpu.memory_space<vmem>>, vector<8x128xf32>
    %c0_3 = arith.constant 0 : index
    %c0_4 = arith.constant 0 : index
    %2 = vector.load %arg3[%c0_3, %c0_4] : memref<8x128xf32, #tpu.memory_space<vmem>>, vector<8x128xf32>
    %c0_5 = arith.constant 0 : index
    %c0_6 = arith.constant 0 : index
    %3 = vector.load %arg4[%c0_5, %c0_6] : memref<8x128xf32, #tpu.memory_space<vmem>>, vector<8x128xf32>
    %4 = arith.subf %0, %2 : vector<8x128xf32>
    %cst = arith.constant 1.000000e-01 : f32
    %5 = vector.broadcast %cst : f32 to vector<8x128xf32>
    %6 = arith.mulf %5, %4 : vector<8x128xf32>
    %7 = arith.subf %1, %3 : vector<8x128xf32>
    %cst_7 = arith.constant 1.000000e-01 : f32
    %8 = vector.broadcast %cst_7 : f32 to vector<8x128xf32>
    %9 = arith.mulf %8, %7 : vector<8x128xf32>
    %10 = arith.subf %6, %9 : vector<8x128xf32>
    %cst_8 = arith.constant 1.000000e+00 : f32
    %11 = vector.broadcast %cst_8 : f32 to vector<8x128xf32>
    %12 = arith.subf %11, %10 : vector<8x128xf32>
    %cst_9 = arith.constant 0.000000e+00 : f32
    %13 = vector.broadcast %cst_9 : f32 to vector<8x128xf32>
    %14 = arith.maximumf %12, %13 : vector<8x128xf32>
    %c0_10 = arith.constant 0 : index
    %c0_11 = arith.constant 0 : index
    %15 = vector.load %arg5[%c0_10, %c0_11] : memref<8x128xf32, #tpu.memory_space<vmem>>, vector<8x128xf32>
    tpu.vector_store %arg5[%c0_10, %c0_11], %14 {strides = array<i32>} : memref<8x128xf32, #tpu.memory_space<vmem>>, vector<8x128xf32>,
    %c0_12 = arith.constant 0 : index
    %c0_13 = arith.constant 0 : index
    %16 = vector.load %arg6[%c0_12, %c0_13] : memref<8x128xf32, #tpu.memory_space<vmem>>, vector<8x128xf32>
    tpu.vector_store %arg6[%c0_12, %c0_13], %6 {strides = array<i32>} : memref<8x128xf32, #tpu.memory_space<vmem>>, vector<8x128xf32>,
    %c0_14 = arith.constant 0 : index
    %c0_15 = arith.constant 0 : index
    %17 = vector.load %arg7[%c0_14, %c0_15] : memref<8x128xf32, #tpu.memory_space<vmem>>, vector<8x128xf32>
    tpu.vector_store %arg7[%c0_14, %c0_15], %9 {strides = array<i32>} : memref<8x128xf32, #tpu.memory_space<vmem>>, vector<8x128xf32>,
    return
  }
  func.func @transform_0(%arg0: i32) -> (i32, i32) {
    %c0_i32 = arith.constant 0 : i32
    %c0_i32_0 = arith.constant 0 : i32
    return %arg0, %c0_i32 : i32, i32
  }
  func.func @transform_1(%arg0: i32) -> (i32, i32) {
    %c0_i32 = arith.constant 0 : i32
    %c0_i32_0 = arith.constant 0 : i32
    return %arg0, %c0_i32 : i32, i32
  }
  func.func @transform_2(%arg0: i32) -> (i32, i32) {
    %c0_i32 = arith.constant 0 : i32
    %c0_i32_0 = arith.constant 0 : i32
    return %arg0, %c0_i32 : i32, i32
  }
  func.func @transform_3(%arg0: i32) -> (i32, i32) {
    %c0_i32 = arith.constant 0 : i32
    %c0_i32_0 = arith.constant 0 : i32
    return %arg0, %c0_i32 : i32, i32
  }
  func.func @transform_4(%arg0: i32) -> (i32, i32) {
    %c0_i32 = arith.constant 0 : i32
    %c0_i32_0 = arith.constant 0 : i32
    return %arg0, %c0_i32 : i32, i32
  }
  func.func @transform_5(%arg0: i32) -> (i32, i32) {
    %c0_i32 = arith.constant 0 : i32
    %c0_i32_0 = arith.constant 0 : i32
    return %arg0, %c0_i32 : i32, i32
  }
  func.func @transform_6(%arg0: i32) -> (i32, i32) {
    %c0_i32 = arith.constant 0 : i32
    %c0_i32_0 = arith.constant 0 : i32
    return %arg0, %c0_i32 : i32, i32
  }
}

</mosaic_0001>

<bundles_post_ra>
// kernel: tpu_custom_call.1
= control target key start
LH: loop header
LB: loop body
LE: loop exit
PB: predicated region body
PF: predicated region fallthrough
CT: control target
= control target key end

     0   :  { %12 = vsyncpa [#allocation3], 0  ;;  %s386_s0 = inlined_call_operand.hbm [shape: f32[8,128], index: 0, kind: input, shape index: {}]   ;;  %s387_s1 = inlined_call_operand.hbm [shape: f32[8,128], index: 1, kind: input, shape index: {}]   ;;  %s388_s2 = inlined_call_operand.hbm [shape: f32[8,128], index: 2, kind: input, shape index: {}]   ;;  %s389_s3 = inlined_call_operand.vmem [shape: f32[8,128], index: 3, kind: input, shape index: {}]   ;;  %s390_s4 = inlined_call_operand.hbm [shape: f32[8,128], index: 4, kind: output, shape index: {0}]   ;;  %s391_s5 = inlined_call_operand.hbm [shape: f32[8,128], index: 5, kind: output, shape index: {1}]   ;;  %s392_s6 = inlined_call_operand.hbm [shape: f32[8,128], index: 6, kind: output, shape index: {2}]  }
   0x1   :  { %13 = vsyncpa [#allocation6], 0 }
   0x2   :  { %14 = vsyncpa [#allocation4], 0 }
   0x3   :  { %15 = vsyncpa [#allocation10], 0  ;;  %s260_s21 = smov [#allocation5]   ;;  %s261_s23 = smov [#allocation2]  }
   0x4   :  { %s32_s22 = sshll.u32 %s260_s21, 4  ;;  %s22_s24 = sshll.u32 %s261_s23, 4  ;;  %s33_s22 = int_to_ptr.vmem [resolvable:$true] %s32_s22  ;;  %s23_s24 = int_to_ptr.vmem [resolvable:$true] %s22_s24 }
   0x5   :  { %s120_s27 = scalar_lea.hbm %s387_s1, 128 }
   0x6   :  { %p121_p0 = scmp.ne.s32.totalorder %s387_s1, %s120_s27  ;;  %p124_p1 = scmp.lt.u32.totalorder %s120_s27, %s387_s1 }
   0x8   :  { %p126_p2 = pnand %p124_p1, %p121_p0 }
   0xa   :  { %129 = shalt.err (!%p126_p2)
}
   0xb   :  { %s130_s8 = scalar_lea.vmem %s33_s22, 128  ;;  %p135_p4 = scmp.lt.s32.totalorder %s33_s22, %s33_s22 }
   0xc   :  { %p131_p3 = scmp.ne.s32.totalorder %s33_s22, %s130_s8  ;;  %p136_p5 = scmp.lt.s32.totalorder %s130_s8, %s130_s8 }
   0xe   :  { %p137_p6 = por %p136_p5, %p135_p4 }
  0x10   :  { %p138_p7 = pnand %p137_p6, %p131_p3 }
  0x12   :  { %141 = shalt.err (!%p138_p7)
}
  0x13   :  { %35 = dma.hbm_to_vmem [thread:$0]  %s387_s1, 128, %s33_s22, [#allocation6]  }
  0x14   :  { %s142_s13 = scalar_lea.hbm %s386_s0, 128 }
  0x15   :  { %p143_p8 = scmp.ne.s32.totalorder %s386_s0, %s142_s13  ;;  %p146_p9 = scmp.lt.u32.totalorder %s142_s13, %s386_s0 }
  0x17   :  { %p148_p10 = pnand %p146_p9, %p143_p8 }
  0x19   :  { %151 = shalt.err (!%p148_p10)
}
  0x1a   :  { %s152_s18 = scalar_lea.vmem %s23_s24, 128  ;;  %p157_p12 = scmp.lt.s32.totalorder %s23_s24, %s23_s24 }
  0x1b   :  { %p153_p11 = scmp.ne.s32.totalorder %s23_s24, %s152_s18  ;;  %p158_p13 = scmp.lt.s32.totalorder %s152_s18, %s152_s18 }
  0x1d   :  { %p159_p0 = por %p158_p13, %p157_p12 }
  0x1f   :  { %p160_p1 = pnand %p159_p0, %p153_p11 }
  0x21   :  { %163 = shalt.err (!%p160_p1)
}
  0x22   :  { %25 = dma.hbm_to_vmem [thread:$0]  %s386_s0, 128, %s23_s24, [#allocation3]  }
  0x23   :  { %s262_s20 = smov [#allocation7]   ;;  %s164_s25 = scalar_lea.hbm %s388_s2, 128 }
  0x24   :  { %s42_s21 = sshll.u32 %s262_s20, 4  ;;  %p165_p2 = scmp.ne.s32.totalorder %s388_s2, %s164_s25  ;;  %s43_s21 = int_to_ptr.vmem [resolvable:$true] %s42_s21 }
  0x25   :  { %p168_p3 = scmp.lt.u32.totalorder %s164_s25, %s388_s2 }
  0x27   :  { %p170_p4 = pnand %p168_p3, %p165_p2 }
  0x29   :  { %173 = shalt.err (!%p170_p4)
}
  0x2a   :  { %s174_s30 = scalar_lea.vmem %s43_s21, 128  ;;  %p179_p6 = scmp.lt.s32.totalorder %s43_s21, %s43_s21 }
  0x2b   :  { %p175_p5 = scmp.ne.s32.totalorder %s43_s21, %s174_s30  ;;  %p180_p7 = scmp.lt.s32.totalorder %s174_s30, %s174_s30 }
  0x2d   :  { %p181_p8 = por %p180_p7, %p179_p6 }
  0x2f   :  { %p182_p9 = pnand %p181_p8, %p175_p5 }
  0x31   :  { %185 = shalt.err (!%p182_p9)
}
  0x32   :  { %45 = dma.hbm_to_vmem [thread:$0]  %s388_s2, 128, %s43_s21, [#allocation6]  }
  0x33   :  { %252 = dma.done.wait [#allocation3], 128  }
  0x34   :  { %253 = vsyncadd [#allocation3], 4294967168 }
  0x35   :  { %254 = dma.done.wait [#allocation6], 256  }
  0x36   :  { %255 = vsyncadd [#allocation6], 4294967040  ;;  %v57_v0 = vld [vmem:[#allocation2] sm:$0xff]  ;;  %v59_v1 = vld [vmem:[#allocation7] sm:$0xff]  ;;  %s263_s7 = smov [#allocation9]   ;;  %s264_s11 = smov [#allocation11]  }
  0x37   :  { %v58_v2 = vld [vmem:[#allocation5] sm:$0xff]  ;;  %s87_s8 = sshll.u32 %s263_s7, 4  ;;  %v61_v3 = vsub.f32 %v57_v0, %v59_v1  ;;  %v60_v4 = vld [vmem:[%s389_s3] sm:$0xff]  ;;  %s97_s12 = sshll.u32 %s264_s11, 4  ;;  %s88_s8 = int_to_ptr.vmem [resolvable:$true] %s87_s8  ;;  %s340_s12 = int_to_ptr.vmem [resolvable:$true] %s97_s12 }
  0x38   :  { %v63_v5 = vsub.f32 %v58_v2, %v60_v4  ;;  %s265_s2 = smov [#allocation8]   ;;  %s186_s14 = scalar_lea.vmem %s88_s8, 128 }
  0x39   :  { %v62_v6 = vmul.f32 0.1, %v61_v3  ;;  %s342_s13 = sshll.u32 %s265_s2, 4  ;;  %p187_p10 = scmp.ne.s32.totalorder %s88_s8, %s186_s14  ;;  %s78_s13 = int_to_ptr.vmem [resolvable:$true] %s342_s13 }
  0x3a   :  { %v64_v7 = vmul.f32 0.1, %v63_v5  ;;  %p191_p11 = scmp.lt.s32.totalorder %s88_s8, %s88_s8  ;;  %p192_p12 = scmp.lt.s32.totalorder %s186_s14, %s186_s14 }
  0x3b   :  { %69 = vst [vmem:[#allocation9] sm:$0xff] %v62_v6 }
  0x3c   :  { %v65_v8 = vsub.f32 %v62_v6, %v64_v7  ;;  %70 = vst [vmem:[#allocation11] sm:$0xff] %v64_v7  ;;  %p193_p13 = por %p192_p12, %p191_p11 }
  0x3e   :  { %p194_p0 = pnand %p193_p13, %p187_p10 }
  0x40   :  { %197 = shalt.err (!%p194_p0)
}
  0x41   :  { %s198_s16 = scalar_lea.hbm %s391_s5, 128 }
  0x42   :  { %p199_p1 = scmp.ne.s32.totalorder %s391_s5, %s198_s16  ;;  %p202_p2 = scmp.lt.u32.totalorder %s198_s16, %s391_s5 }
  0x44   :  { %p204_p3 = pnand %p202_p2, %p199_p1 }
  0x46   :  { %207 = shalt.err (!%p204_p3)
}
  0x47   :  { %90 = dma.vmem_to_hbm [thread:$0]  %s88_s8, 128, %s391_s5, [#allocation10]  }
  0x48   :  { %s208_s22 = scalar_lea.vmem %s340_s12, 128  ;;  %p213_p5 = scmp.lt.s32.totalorder %s340_s12, %s340_s12 }
  0x49   :  { %p209_p4 = scmp.ne.s32.totalorder %s340_s12, %s208_s22  ;;  %p214_p6 = scmp.lt.s32.totalorder %s208_s22, %s208_s22 }
  0x4b   :  { %p215_p7 = por %p214_p6, %p213_p5 }
  0x4d   :  { %p216_p8 = pnand %p215_p7, %p209_p4 }
  0x4f   :  { %219 = shalt.err (!%p216_p8)
}
  0x50   :  { %s220_s26 = scalar_lea.hbm %s392_s6, 128 }
  0x51   :  { %p221_p9 = scmp.ne.s32.totalorder %s392_s6, %s220_s26  ;;  %p224_p10 = scmp.lt.u32.totalorder %s220_s26, %s392_s6 }
  0x53   :  { %p226_p11 = pnand %p224_p10, %p221_p9 }
  0x55   :  { %229 = shalt.err (!%p226_p11)
}
  0x56   :  { %100 = dma.vmem_to_hbm [thread:$0]  %s340_s12, 128, %s392_s6, [#allocation10]   ;;  %v66_v9 = vsub.f32 1.0, %v65_v8 }
  0x57   :  { %s230_s24 = scalar_lea.vmem %s78_s13, 128  ;;  %p235_p13 = scmp.lt.s32.totalorder %s78_s13, %s78_s13 }
  0x58   :  { %v67_v10 = vmax.f32 %v66_v9, 0.0  ;;  %p231_p12 = scmp.ne.s32.totalorder %s78_s13, %s230_s24  ;;  %p236_p0 = scmp.lt.s32.totalorder %s230_s24, %s230_s24 }
  0x5a   :  { %68 = vst [vmem:[#allocation8] sm:$0xff] %v67_v10  ;;  %p237_p1 = por %p236_p0, %p235_p13 }
  0x5c   :  { %p238_p2 = pnand %p237_p1, %p231_p12 }
  0x5e   :  { %241 = shalt.err (!%p238_p2)
}
  0x5f   :  { %s242_s9 = scalar_lea.hbm %s390_s4, 128 }
  0x60   :  { %p243_p3 = scmp.ne.s32.totalorder %s390_s4, %s242_s9  ;;  %p246_p4 = scmp.lt.u32.totalorder %s242_s9, %s390_s4 }
  0x62   :  { %p248_p5 = pnand %p246_p4, %p243_p3 }
  0x64   :  { %251 = shalt.err (!%p248_p5)
}
  0x65   :  { %80 = dma.vmem_to_hbm [thread:$0]  %s78_s13, 128, %s390_s4, [#allocation4]  }
  0x66   :  { %256 = dma.done.wait [#allocation4], 128  }
  0x67   :  { %257 = vsyncadd [#allocation4], 4294967168 }
  0x68   :  { %258 = dma.done.wait [#allocation10], 256  }
  0x69   :  { %259 = vsyncadd [#allocation10], 4294967040 }
  0x6a   :  { %110 = vsyncpa [#allocation3], 1 }
  0x6b   :  { %111 = vsyncpa [#allocation6], 1 }
  0x6c   :  { %112 = vsyncpa [#allocation4], 1 }
  0x6d   :  { %113 = vsyncpa [#allocation10], 1 }

</bundles_post_ra>
